<compile_context>
chip_gen: v5e
topology: v5e:2x2
jax: 0.10.0
libtpu: 0.0.40
codegen_flags: <defaults>
</compile_context>

<pallas_src>
import functools

import jax
import jax.numpy as jnp
import numpy as np
from jax.experimental import pallas as pl
from jax.experimental.pallas import tpu as pltpu

LANES = 128      # lane-dense feature width for every [*, 128] intermediate
TXT_OFF = 32     # lanes carrying embedding dims (txt_proj input rows)
NUM_OFF = 64     # lanes carrying raw numeric features (num_fc input rows)

# weight-slab block ids (each block is [128,128])
W_BRANCH, W_EMBED, W_FUSION, W_CLF1, W_CLFO = range(5)
N_WBLOCKS = 5
# bias-slab row ids
B_CONV, B_BRANCH, B_FUSION, B_CLF1, B_CLFO = range(5)
N_BROWS = 8


# -----------------------------------------------------------------------------
# The single fused forward kernel (one batch block per grid step)
# -----------------------------------------------------------------------------
def _fused_forward_kernel(
    patches_ref,   # [TB*P, CK] f32  im2col patches (CK = C*9, NOT lane-padded)
    tok_ref,       # [TB*S, 2]  i32  col 0 = token id, col 1 = attention mask
    num_ref,       # [TB, 128]  f32  numeric features at lanes NUM_OFF:NUM_OFF+F
    conv_w_ref,    # [CK, 128]  bf16 conv weight (out channels at lanes 0:8)
    w_slab_ref,    # [640, 128] bf16 branch | embed | fusion | clf1 | clf_out
    b_slab_ref,    # [8, 128]   f32  conv | branch | fusion | clf1 | clf_out biases
    out_ref,       # [TB, 128]  f32  first num_classes lanes = logits
    *, TB, P, S,
):
    f32 = jnp.float32

    def w(k):      # static slab slice, upcast bf16 -> f32 in vregs
        return w_slab_ref[k * LANES:(k + 1) * LANES, :].astype(f32)

    def b(k):      # static [1,128] bias row
        return b_slab_ref[k:k + 1, :]

    # ---- image branch: conv3x3 as ONE matmul over im2col patches (batch folded
    # into M), ReLU, then GAP as reshape + cross-sublane sum (no O(B^2) pool matrix).
    conv = jnp.dot(patches_ref[...], conv_w_ref[...].astype(f32),
                   preferred_element_type=f32)                        # [TB*P, 128]
    conv = jnp.maximum(conv + b(B_CONV), 0.0)
    img_pooled = jnp.sum(conv.reshape(TB, P, LANES), axis=1) * (1.0 / P)  # lanes 0:8

    # ---- text branch: int32 one-hot * mask, per-batch sum, embedding matmul.
    # (assumes vocab <= 128, enforced in pad_params; denominator is sum(mask).)
    tok = tok_ref[...]                                                # [TB*S, 2] i32
    ids = tok[:, 0:1]
    msk = tok[:, 1:2].astype(f32)
    vocab_iota = jax.lax.broadcasted_iota(jnp.int32, (TB * S, LANES), 1)
    onehot = (ids == vocab_iota).astype(f32) * msk                    # [TB*S, 128]
    counts = jnp.sum(onehot.reshape(TB, S, LANES), axis=1)            # [TB, 128]
    denom = jnp.maximum(jnp.sum(msk.reshape(TB, S, 1), axis=1), 1.0)  # [TB, 1]
    txt_pooled = jnp.dot(counts, w(W_EMBED),
                         preferred_element_type=f32) / denom          # lanes 32:64

    # ---- the three branch inputs live in DISJOINT lanes, so their sum IS the
    # concatenation; one packed matmul applies img_proj/txt_proj/num_fc together.
    branch_in = img_pooled + txt_pooled + num_ref[...]                # [TB, 128]
    feats = jnp.maximum(
        jnp.dot(branch_in, w(W_BRANCH), preferred_element_type=f32) + b(B_BRANCH),
        0.0)                                   # img | txt | num feats at 0:32|32:64|64:80

    # ---- fusion with the ORIGINAL unsplit 80->64 weight (padded to 128x128).
    fused = jnp.maximum(
        jnp.dot(feats, w(W_FUSION), preferred_element_type=f32) + b(B_FUSION), 0.0)

    # ---- classifier head.
    # TODO(synk): nn.Dropout is identity at inference; no stochastic dropout applied.
    h = jnp.maximum(
        jnp.dot(fused, w(W_CLF1), preferred_element_type=f32) + b(B_CLF1), 0.0)
    logits = jnp.dot(h, w(W_CLFO), preferred_element_type=f32) + b(B_CLFO)
    out_ref[...] = logits.astype(out_ref.dtype)                       # [TB, 128]


# -----------------------------------------------------------------------------
# Parameter init (deterministic, synthetic)
# -----------------------------------------------------------------------------
def init_params(key, *, num_classes=6, in_ch=4, conv_oc=8, img_dim=32, vocab=50,
                emb_dim=32, txt_dim=32, num_feats=5, num_dim=16, fusion_hidden=64,
                clf_hidden=(32,)):
    keys = jax.random.split(key, 10)

    def lin_init(k, i, o, scale=0.05):
        kw, kb = jax.random.split(k)
        return (jax.random.normal(kw, (i, o), jnp.float32) * scale,
                jax.random.normal(kb, (1, o), jnp.float32) * scale)

    p = {}
    p["conv_w"] = jax.random.normal(keys[0], (in_ch * 9, conv_oc), jnp.float32) * 0.05
    p["conv_b"] = jax.random.normal(keys[1], (1, conv_oc), jnp.float32) * 0.05
    p["img_proj"] = lin_init(keys[2], conv_oc, img_dim)
    p["embed"] = jax.random.normal(keys[3], (vocab, emb_dim), jnp.float32) * 0.05
    p["txt_proj"] = lin_init(keys[4], emb_dim, txt_dim)
    p["num_fc"] = lin_init(keys[5], num_feats, num_dim)
    p["fusion"] = lin_init(keys[6], img_dim + txt_dim + num_dim, fusion_hidden)
    p["clf1"] = lin_init(keys[7], fusion_hidden, clf_hidden[0])
    p["clf_out"] = lin_init(keys[8], clf_hidden[0], num_classes)
    return p


def pad_params(p):
    """Pack params into (conv_w[CK,128] bf16, w_slab[640,128] bf16, b_slab[8,128] f32)."""
    f32 = jnp.float32
    embed = p["embed"]
    vocab, emb_dim = embed.shape
    conv_ck, conv_oc = p["conv_w"].shape
    img_w, img_b = p["img_proj"]
    txt_w, txt_b = p["txt_proj"]
    num_w, num_b = p["num_fc"]
    fus_w, fus_b = p["fusion"]
    c1_w, c1_b = p["clf1"]
    co_w, co_b = p["clf_out"]
    img_dim, txt_dim, num_dim = img_w.shape[1], txt_w.shape[1], num_w.shape[1]
    num_in = num_w.shape[0]

    # layout assumptions of the lane-packed kernel
    assert vocab <= LANES, "one-hot embedding trick requires vocab <= 128"
    assert conv_oc <= TXT_OFF and TXT_OFF + emb_dim <= NUM_OFF
    assert NUM_OFF + num_in <= LANES
    assert fus_w.shape[0] == img_dim + txt_dim + num_dim <= LANES
    assert max(fus_w.shape[1], c1_w.shape[0], c1_w.shape[1],
               co_w.shape[0], co_w.shape[1]) <= LANES

    IMG_OUT, TXT_OUT, NUM_OUT = 0, img_dim, img_dim + txt_dim     # concat order

    conv_w = jnp.zeros((conv_ck, LANES), f32).at[:, :conv_oc].set(p["conv_w"])

    branch = (jnp.zeros((LANES, LANES), f32)
              .at[0:conv_oc, IMG_OUT:IMG_OUT + img_dim].set(img_w)
              .at[TXT_OFF:TXT_OFF + emb_dim, TXT_OUT:TXT_OUT + txt_dim].set(txt_w)
              .at[NUM_OFF:NUM_OFF + num_in, NUM_OUT:NUM_OUT + num_dim].set(num_w))
    embed_p = (jnp.zeros((LANES, LANES), f32)
               .at[0:vocab, TXT_OFF:TXT_OFF + emb_dim].set(embed))
    fusion = (jnp.zeros((LANES, LANES), f32)
              .at[0:fus_w.shape[0], 0:fus_w.shape[1]].set(fus_w))
    clf1 = jnp.zeros((LANES, LANES), f32).at[0:c1_w.shape[0], 0:c1_w.shape[1]].set(c1_w)
    clfo = jnp.zeros((LANES, LANES), f32).at[0:co_w.shape[0], 0:co_w.shape[1]].set(co_w)

    w_slab = jnp.concatenate([branch, embed_p, fusion, clf1, clfo],
                             axis=0).astype(jnp.bfloat16)            # [640, 128]

    def brow(pairs):
        row = jnp.zeros((1, LANES), f32)
        for bias, off in pairs:
            row = row.at[:, off:off + bias.shape[-1]].set(bias.reshape(1, -1))
        return row

    b_slab = jnp.concatenate([
        brow([(p["conv_b"], 0)]),
        brow([(img_b, IMG_OUT), (txt_b, TXT_OUT), (num_b, NUM_OUT)]),
        brow([(fus_b, 0)]),
        brow([(c1_b, 0)]),
        brow([(co_b, 0)]),
        jnp.zeros((N_BROWS - 5, LANES), f32),
    ], axis=0)                                                        # [8, 128]

    return conv_w.astype(jnp.bfloat16), w_slab, b_slab


# -----------------------------------------------------------------------------
# Forward pass (one fused pallas_call; only im2col / tiny packing glue in XLA)
# -----------------------------------------------------------------------------
def _im2col_3x3(img_nchw):
    B, C, H, W = img_nchw.shape
    x = jnp.transpose(img_nchw, (0, 2, 3, 1))                 # NCHW -> NHWC
    xp = jnp.pad(x, ((0, 0), (1, 1), (1, 1), (0, 0)))
    # contraction index = c*9 + kh*3 + kw (consistent with conv_w layout)
    shifts = [xp[:, i:i + H, j:j + W, :] for i in range(3) for j in range(3)]
    patches = jnp.stack(shifts, axis=-1)                       # [B, H, W, C, 9]
    return patches.reshape(B, H * W, C * 9)


def forward(kernel_params, img, input_ids, attention_mask, numerical_attributes,
            *, num_classes=6, batch_block=None):
    conv_w, w_slab, b_slab = kernel_params
    B, C, H, W = img.shape
    S = input_ids.shape[1]
    P = H * W
    ck = C * 9

    patches2d = _im2col_3x3(img).reshape(B * P, ck)            # [B*P, 36], no lane pad
    tok = jnp.stack([input_ids.astype(jnp.int32),
                     attention_mask.astype(jnp.int32)], axis=-1).reshape(B * S, 2)
    nfeat = numerical_attributes.shape[-1]
    num_pad = (jnp.zeros((B, LANES), jnp.float32)
               .at[:, NUM_OFF:NUM_OFF + nfeat].set(numerical_attributes.astype(jnp.float32)))

    tb = batch_block if batch_block is not None else (8 if B % 8 == 0 else B)
    assert B % tb == 0, (B, tb)
    grid = (B // tb,)

    cost = pl.CostEstimate(
        flops=2 * B * (P * ck * LANES + N_WBLOCKS * LANES * LANES),
        transcendentals=0,
        bytes_accessed=(patches2d.size * 4 + tok.size * 4 + num_pad.size * 4
                        + conv_w.size * 2 + w_slab.size * 2 + b_slab.size * 4
                        + B * LANES * 4),
    )

    kernel = functools.partial(_fused_forward_kernel, TB=tb, P=P, S=S)
    out = pl.pallas_call(
        kernel,
        out_shape=jax.ShapeDtypeStruct((B, LANES), jnp.float32),
        grid=grid,
        in_specs=[
            pl.BlockSpec((tb * P, ck), lambda b: (b, 0)),      # patches (per batch blk)
            pl.BlockSpec((tb * S, 2), lambda b: (b, 0)),       # token ids + mask
            pl.BlockSpec((tb, LANES), lambda b: (b, 0)),       # numeric features
            pl.BlockSpec(conv_w.shape, lambda b: (0, 0)),      # conv weight (resident)
            pl.BlockSpec(w_slab.shape, lambda b: (0, 0)),      # packed weight slab
            pl.BlockSpec(b_slab.shape, lambda b: (0, 0)),      # packed bias slab
        ],
        out_specs=pl.BlockSpec((tb, LANES), lambda b: (b, 0)),
        compiler_params=pltpu.CompilerParams(dimension_semantics=("parallel",)),
        cost_estimate=cost,
    )(patches2d, tok, num_pad, conv_w, w_slab, b_slab)
    return out[:, :num_classes]


# Pure-JAX reference for the correctness sanity check.
def forward_ref(params, img, input_ids, attention_mask, numerical_attributes):
    patches = _im2col_3x3(img)
    y = jnp.maximum(patches @ params["conv_w"] + params["conv_b"][None], 0.0)
    img_pooled = jnp.mean(y, axis=1)
    img_feat = jnp.maximum(img_pooled @ params["img_proj"][0] + params["img_proj"][1], 0.0)

    emb = jnp.take(params["embed"], input_ids, axis=0)
    m = attention_mask.astype(jnp.float32)
    txt_pooled = jnp.sum(emb * m[:, :, None], axis=1) / jnp.maximum(
        jnp.sum(m, axis=1, keepdims=True), 1.0)
    txt_feat = jnp.maximum(txt_pooled @ params["txt_proj"][0] + params["txt_proj"][1], 0.0)

    num_feat = jnp.maximum(
        numerical_attributes @ params["num_fc"][0] + params["num_fc"][1], 0.0)
    fused = jnp.concatenate([img_feat, txt_feat, num_feat], axis=-1)
    fused = jnp.maximum(fused @ params["fusion"][0] + params["fusion"][1], 0.0)
    h = jnp.maximum(fused @ params["clf1"][0] + params["clf1"][1], 0.0)
    return h @ params["clf_out"][0] + params["clf_out"][1]


if __name__ == "__main__":
    key = jax.random.PRNGKey(0)
    k_param, k_img, k_ids, k_len, k_num = jax.random.split(key, 5)

    B, C, H, W = 2, 4, 16, 16
    S, VOCAB, NUM_FEATS = 8, 50, 5

    params = init_params(k_param)
    # Weights are stored bf16 inside the kernel slab; round-trip the reference
    # params through bf16 so the kernel's bf16 storage is lossless w.r.t. the
    # f32 reference and the tolerance can stay tight.
    params = jax.tree_util.tree_map(
        lambda x: x.astype(jnp.bfloat16).astype(jnp.float32), params)
    kernel_params = pad_params(params)

    img = jax.random.normal(k_img, (B, C, H, W), jnp.float32)           # NCHW
    input_ids = jax.random.randint(k_ids, (B, S), 0, VOCAB, jnp.int32)
    lens = jax.random.randint(k_len, (B,), 3, S + 1, jnp.int32)
    attention_mask = (jnp.arange(S)[None, :] < lens[:, None]).astype(jnp.int32)
    numerical_attributes = jax.random.normal(k_num, (B, NUM_FEATS), jnp.float32)

    fwd = jax.jit(forward)
    logits = jax.block_until_ready(
        fwd(kernel_params, img, input_ids, attention_mask, numerical_attributes))
    ref = forward_ref(params, img, input_ids, attention_mask, numerical_attributes)

    assert logits.shape == (B, 6), logits.shape
    np.testing.assert_allclose(np.asarray(logits), np.asarray(ref), rtol=1e-4, atol=1e-4)

    print("KERNEL_OK")
</pallas_src>

<mosaic_0001>
module attributes {stable_mosaic.version = 11 : i64} {
  func.func @_fused_forward_kernel(%arg0: i32, %arg1: memref<512x36xf32, #tpu.memory_space<vmem>>, %arg2: memref<16x2xi32, #tpu.memory_space<vmem>>, %arg3: memref<2x128xf32, #tpu.memory_space<vmem>>, %arg4: memref<36x128xbf16, #tpu.memory_space<vmem>>, %arg5: memref<640x128xbf16, #tpu.memory_space<vmem>>, %arg6: memref<8x128xf32, #tpu.memory_space<vmem>>, %arg7: memref<2x128xf32, #tpu.memory_space<vmem>>) attributes {dimension_semantics = [#tpu.dimension_semantics<parallel>], iteration_bounds = array<i64: 1>, scalar_prefetch = 0 : i64, scratch_operands = 0 : i64, tpu.core_type = #tpu.core_type<tc>, window_params = [{transform_indices = @transform_0, window_bounds = array<i64: 512, 36>}, {transform_indices = @transform_1, window_bounds = array<i64: 16, 2>}, {transform_indices = @transform_2, window_bounds = array<i64: 2, 128>}, {pipeline_mode = #tpu.pipeline_mode<synchronous>, transform_indices = @transform_3, window_bounds = array<i64: 36, 128>}, {pipeline_mode = #tpu.pipeline_mode<synchronous>, transform_indices = @transform_4, window_bounds = array<i64: 640, 128>}, {pipeline_mode = #tpu.pipeline_mode<synchronous>, transform_indices = @transform_5, window_bounds = array<i64: 8, 128>}, {transform_indices = @transform_6, window_bounds = array<i64: 2, 128>}]} {
    %c0 = arith.constant 0 : index
    %c0_0 = arith.constant 0 : index
    %0 = vector.load %arg1[%c0, %c0_0] : memref<512x36xf32, #tpu.memory_space<vmem>>, vector<512x36xf32>
    %c0_1 = arith.constant 0 : index
    %c0_2 = arith.constant 0 : index
    %1 = vector.load %arg4[%c0_1, %c0_2] : memref<36x128xbf16, #tpu.memory_space<vmem>>, vector<36x128xbf16>
    %2 = arith.extf %1 : vector<36x128xbf16> to vector<36x128xf32>
    %cst = arith.constant dense<0.000000e+00> : vector<512x128xf32>
    %3 = tpu.matmul %0, %2, %cst {dimension_numbers = #tpu.dot_dimension_numbers<[1], [0], [0], [1], [0, 0, 1, 1], [], []>} : vector<512x36xf32>, vector<36x128xf32>, vector<512x128xf32> -> vector<512x128xf32>
    %c0_3 = arith.constant 0 : index
    %c0_4 = arith.constant 0 : index
    %4 = vector.load %arg6[%c0_3, %c0_4] : memref<8x128xf32, #tpu.memory_space<vmem>>, vector<1x128xf32>
    %5 = vector.broadcast %4 : vector<1x128xf32> to vector<512x128xf32>
    %6 = arith.addf %3, %5 : vector<512x128xf32>
    %cst_5 = arith.constant 0.000000e+00 : f32
    %7 = vector.broadcast %cst_5 : f32 to vector<512x128xf32>
    %8 = arith.maximumf %6, %7 : vector<512x128xf32>
    %9 = vector.shape_cast %8 : vector<512x128xf32> to vector<2x256x128xf32>
    %cst_6 = arith.constant dense<0.000000e+00> : vector<2x128xf32>
    %10 = vector.multi_reduction <add>, %9, %cst_6 [1] : vector<2x256x128xf32> to vector<2x128xf32>
    %cst_7 = arith.constant 3.906250e-03 : f32
    %11 = vector.broadcast %cst_7 : f32 to vector<2x128xf32>
    %12 = arith.mulf %10, %11 : vector<2x128xf32>
    %c0_8 = arith.constant 0 : index
    %c0_9 = arith.constant 0 : index
    %13 = vector.load %arg2[%c0_8, %c0_9] : memref<16x2xi32, #tpu.memory_space<vmem>>, vector<16x2xi32>
    %14 = vector.extract_strided_slice %13 {offsets = [0, 0], sizes = [16, 1], strides = [1, 1]} : vector<16x2xi32> to vector<16x1xi32>
    %15 = vector.extract_strided_slice %13 {offsets = [0, 1], sizes = [16, 1], strides = [1, 1]} : vector<16x2xi32> to vector<16x1xi32>
    %16 = arith.sitofp %15 : vector<16x1xi32> to vector<16x1xf32>
    %17 = tpu.iota {dimensions = array<i32: 1>} : vector<16x128xi32>
    %18 = vector.broadcast %14 : vector<16x1xi32> to vector<16x128xi32>
    %19 = arith.cmpi eq, %18, %17 : vector<16x128xi32>
    %20 = arith.extui %19 : vector<16x128xi1> to vector<16x128xi32>
    %21 = arith.sitofp %20 : vector<16x128xi32> to vector<16x128xf32>
    %22 = vector.broadcast %16 : vector<16x1xf32> to vector<16x128xf32>
    %23 = arith.mulf %21, %22 : vector<16x128xf32>
    %24 = vector.shape_cast %23 : vector<16x128xf32> to vector<2x8x128xf32>
    %cst_10 = arith.constant dense<0.000000e+00> : vector<2x128xf32>
    %25 = vector.multi_reduction <add>, %24, %cst_10 [1] : vector<2x8x128xf32> to vector<2x128xf32>
    %26 = vector.shape_cast %16 : vector<16x1xf32> to vector<2x8x1xf32>
    %cst_11 = arith.constant dense<0.000000e+00> : vector<2x1xf32>
    %27 = vector.multi_reduction <add>, %26, %cst_11 [1] : vector<2x8x1xf32> to vector<2x1xf32>
    %cst_12 = arith.constant 1.000000e+00 : f32
    %28 = vector.broadcast %cst_12 : f32 to vector<2x1xf32>
    %29 = arith.maximumf %27, %28 : vector<2x1xf32>
    %c128 = arith.constant 128 : index
    %c0_13 = arith.constant 0 : index
    %30 = vector.load %arg5[%c128, %c0_13] : memref<640x128xbf16, #tpu.memory_space<vmem>>, vector<128x128xbf16>
    %31 = arith.extf %30 : vector<128x128xbf16> to vector<128x128xf32>
    %cst_14 = arith.constant dense<0.000000e+00> : vector<2x128xf32>
    %32 = tpu.matmul %25, %31, %cst_14 {dimension_numbers = #tpu.dot_dimension_numbers<[1], [0], [0], [1], [0, 0, 1, 1], [], []>} : vector<2x128xf32>, vector<128x128xf32>, vector<2x128xf32> -> vector<2x128xf32>
    %33 = vector.broadcast %29 : vector<2x1xf32> to vector<2x128xf32>
    %34 = arith.divf %32, %33 : vector<2x128xf32>
    %35 = arith.addf %12, %34 : vector<2x128xf32>
    %c0_15 = arith.constant 0 : index
    %c0_16 = arith.constant 0 : index
    %36 = vector.load %arg3[%c0_15, %c0_16] : memref<2x128xf32, #tpu.memory_space<vmem>>, vector<2x128xf32>
    %37 = arith.addf %35, %36 : vector<2x128xf32>
    %c0_17 = arith.constant 0 : index
    %c0_18 = arith.constant 0 : index
    %38 = vector.load %arg5[%c0_17, %c0_18] : memref<640x128xbf16, #tpu.memory_space<vmem>>, vector<128x128xbf16>
    %39 = arith.extf %38 : vector<128x128xbf16> to vector<128x128xf32>
    %cst_19 = arith.constant dense<0.000000e+00> : vector<2x128xf32>
    %40 = tpu.matmul %37, %39, %cst_19 {dimension_numbers = #tpu.dot_dimension_numbers<[1], [0], [0], [1], [0, 0, 1, 1], [], []>} : vector<2x128xf32>, vector<128x128xf32>, vector<2x128xf32> -> vector<2x128xf32>
    %c1 = arith.constant 1 : index
    %c0_20 = arith.constant 0 : index
    %41 = vector.load %arg6[%c1, %c0_20] : memref<8x128xf32, #tpu.memory_space<vmem>>, vector<1x128xf32>
    %42 = vector.broadcast %41 : vector<1x128xf32> to vector<2x128xf32>
    %43 = arith.addf %40, %42 : vector<2x128xf32>
    %cst_21 = arith.constant 0.000000e+00 : f32
    %44 = vector.broadcast %cst_21 : f32 to vector<2x128xf32>
    %45 = arith.maximumf %43, %44 : vector<2x128xf32>
    %c256 = arith.constant 256 : index
    %c0_22 = arith.constant 0 : index
    %46 = vector.load %arg5[%c256, %c0_22] : memref<640x128xbf16, #tpu.memory_space<vmem>>, vector<128x128xbf16>
    %47 = arith.extf %46 : vector<128x128xbf16> to vector<128x128xf32>
    %cst_23 = arith.constant dense<0.000000e+00> : vector<2x128xf32>
    %48 = tpu.matmul %45, %47, %cst_23 {dimension_numbers = #tpu.dot_dimension_numbers<[1], [0], [0], [1], [0, 0, 1, 1], [], []>} : vector<2x128xf32>, vector<128x128xf32>, vector<2x128xf32> -> vector<2x128xf32>
    %c2 = arith.constant 2 : index
    %c0_24 = arith.constant 0 : index
    %49 = vector.load %arg6[%c2, %c0_24] : memref<8x128xf32, #tpu.memory_space<vmem>>, vector<1x128xf32>
    %50 = vector.broadcast %49 : vector<1x128xf32> to vector<2x128xf32>
    %51 = arith.addf %48, %50 : vector<2x128xf32>
    %cst_25 = arith.constant 0.000000e+00 : f32
    %52 = vector.broadcast %cst_25 : f32 to vector<2x128xf32>
    %53 = arith.maximumf %51, %52 : vector<2x128xf32>
    %c384 = arith.constant 384 : index
    %c0_26 = arith.constant 0 : index
    %54 = vector.load %arg5[%c384, %c0_26] : memref<640x128xbf16, #tpu.memory_space<vmem>>, vector<128x128xbf16>
    %55 = arith.extf %54 : vector<128x128xbf16> to vector<128x128xf32>
    %cst_27 = arith.constant dense<0.000000e+00> : vector<2x128xf32>
    %56 = tpu.matmul %53, %55, %cst_27 {dimension_numbers = #tpu.dot_dimension_numbers<[1], [0], [0], [1], [0, 0, 1, 1], [], []>} : vector<2x128xf32>, vector<128x128xf32>, vector<2x128xf32> -> vector<2x128xf32>
    %c3 = arith.constant 3 : index
    %c0_28 = arith.constant 0 : index
    %57 = vector.load %arg6[%c3, %c0_28] : memref<8x128xf32, #tpu.memory_space<vmem>>, vector<1x128xf32>
    %58 = vector.broadcast %57 : vector<1x128xf32> to vector<2x128xf32>
    %59 = arith.addf %56, %58 : vector<2x128xf32>
    %cst_29 = arith.constant 0.000000e+00 : f32
    %60 = vector.broadcast %cst_29 : f32 to vector<2x128xf32>
    %61 = arith.maximumf %59, %60 : vector<2x128xf32>
    %c512 = arith.constant 512 : index
    %c0_30 = arith.constant 0 : index
    %62 = vector.load %arg5[%c512, %c0_30] : memref<640x128xbf16, #tpu.memory_space<vmem>>, vector<128x128xbf16>
    %63 = arith.extf %62 : vector<128x128xbf16> to vector<128x128xf32>
    %cst_31 = arith.constant dense<0.000000e+00> : vector<2x128xf32>
    %64 = tpu.matmul %61, %63, %cst_31 {dimension_numbers = #tpu.dot_dimension_numbers<[1], [0], [0], [1], [0, 0, 1, 1], [], []>} : vector<2x128xf32>, vector<128x128xf32>, vector<2x128xf32> -> vector<2x128xf32>
    %c4 = arith.constant 4 : index
    %c0_32 = arith.constant 0 : index
    %65 = vector.load %arg6[%c4, %c0_32] : memref<8x128xf32, #tpu.memory_space<vmem>>, vector<1x128xf32>
    %66 = vector.broadcast %65 : vector<1x128xf32> to vector<2x128xf32>
    %67 = arith.addf %64, %66 : vector<2x128xf32>
    %c0_33 = arith.constant 0 : index
    %c0_34 = arith.constant 0 : index
    %68 = vector.load %arg7[%c0_33, %c0_34] : memref<2x128xf32, #tpu.memory_space<vmem>>, vector<2x128xf32>
    tpu.vector_store %arg7[%c0_33, %c0_34], %67 {strides = array<i32>} : memref<2x128xf32, #tpu.memory_space<vmem>>, vector<2x128xf32>,
    return
  }
  func.func @transform_0(%arg0: i32) -> (i32, i32) {
    %c0_i32 = arith.constant 0 : i32
    %c0_i32_0 = arith.constant 0 : i32
    return %arg0, %c0_i32 : i32, i32
  }
  func.func @transform_1(%arg0: i32) -> (i32, i32) {
    %c0_i32 = arith.constant 0 : i32
    %c0_i32_0 = arith.constant 0 : i32
    return %arg0, %c0_i32 : i32, i32
  }
  func.func @transform_2(%arg0: i32) -> (i32, i32) {
    %c0_i32 = arith.constant 0 : i32
    %c0_i32_0 = arith.constant 0 : i32
    return %arg0, %c0_i32 : i32, i32
  }
  func.func @transform_3(%arg0: i32) -> (i32, i32) {
    %c0_i32 = arith.constant 0 : i32
    %c0_i32_0 = arith.constant 0 : i32
    %c0_i32_1 = arith.constant 0 : i32
    return %c0_i32, %c0_i32_0 : i32, i32
  }
  func.func @transform_4(%arg0: i32) -> (i32, i32) {
    %c0_i32 = arith.constant 0 : i32
    %c0_i32_0 = arith.constant 0 : i32
    %c0_i32_1 = arith.constant 0 : i32
    return %c0_i32, %c0_i32_0 : i32, i32
  }
  func.func @transform_5(%arg0: i32) -> (i32, i32) {
    %c0_i32 = arith.constant 0 : i32
    %c0_i32_0 = arith.constant 0 : i32
    %c0_i32_1 = arith.constant 0 : i32
    return %c0_i32, %c0_i32_0 : i32, i32
  }
  func.func @transform_6(%arg0: i32) -> (i32, i32) {
    %c0_i32 = arith.constant 0 : i32
    %c0_i32_0 = arith.constant 0 : i32
    return %arg0, %c0_i32 : i32, i32
  }
}

</mosaic_0001>

<bundles_post_ra>
// kernel: forward.1
= control target key start
LH: loop header
LB: loop body
LE: loop exit
PB: predicated region body
PF: predicated region fallthrough
CT: control target
= control target key end

     0   :  { %vm293_vm0 = vcmask 1043456   ;;  %s2041_s0 = inlined_call_operand.vmem [shape: f32[512,36], index: 0, kind: input, shape index: {}]   ;;  %s2042_s1 = inlined_call_operand.vmem [shape: s32[16,2], index: 1, kind: input, shape index: {}]   ;;  %s2043_s2 = inlined_call_operand.vmem [shape: f32[2,128], index: 2, kind: input, shape index: {}]   ;;  %s2044_s3 = inlined_call_operand.vmem [shape: bf16[36,128], index: 3, kind: input, shape index: {}]   ;;  %s2045_s4 = inlined_call_operand.vmem [shape: bf16[640,128], index: 4, kind: input, shape index: {}]   ;;  %s2046_s5 = inlined_call_operand.vmem [shape: f32[8,128], index: 5, kind: input, shape index: {}]   ;;  %s2047_s6 = inlined_call_operand.hbm [shape: f32[2,128], index: 6, kind: output, shape index: {}]  }
   0x1   :  { %v92_v0 = vld [vmem:[%s2044_s3 + $0x10] sm:$0x3]  ;;  %v1276_v1 = vld [vmem:[%s2044_s3 + $0x8] sm:$0xff]   ;;  %v1109_v4 = vld [vmem:[%s2044_s3] sm:$0xff]  }
   0x2   :  { %v97_v2 = vunpack.c.l.bf16 %v92_v0  ;;  %v1115_v3 = vunpack.c.h.bf16 %v1276_v1  ;;  %v1114_v5 = vunpack.c.l.bf16 %v1276_v1  ;;  %v1111_v6 = vunpack.c.h.bf16 %v1109_v4 }
   0x4   :  { %1041 = vmatpush.msk.msra.mxu0 %vm293_vm0, %v97_v2  ;;  %1316 = vmatpush.msk.msra.mxu1 %vm293_vm0, %v97_v2 }
   0x5   :  { %1318 = vmatpush.msk.msra.mxu3 %vm293_vm0, %v97_v2  ;;  %1317 = vmatpush.msk.msra.mxu2 %vm293_vm0, %v97_v2 }
   0x6   :  { %309 = vmatpush.msra.mxu0 %v1115_v3  ;;  %1319 = vmatpush.msra.mxu1 %v1115_v3 }
   0x7   :  { %1321 = vmatpush.msra.mxu3 %v1115_v3  ;;  %1320 = vmatpush.msra.mxu2 %v1115_v3 }
   0x8   :  { %11 = vsyncpa [#allocation3], 0  ;;  %310 = vmatpush.msra.mxu0 %v1114_v5  ;;  %1322 = vmatpush.msra.mxu1 %v1114_v5  ;;  %v1110_v7 = vunpack.c.l.bf16 %v1109_v4  ;;  %v24_v8 = vld [vmem:[%s2041_s0] sm:$0xff]  ;;  %vm100_vm1 = vcmask 293888   ;;  %v45_v9 = vld [vmem:[%s2041_s0 + $0xa8] sm:$0xff]  ;;  %v1372_v12 = vmov 0  }
   0x9   :  { %1324 = vmatpush.msra.mxu3 %v1114_v5  ;;  %1323 = vmatpush.msra.mxu2 %v1114_v5  ;;  %v69_v10 = vld [vmem:[%s2041_s0 + $0x168] sm:$0xff]  ;;  %v1434_v11 = vld [vmem:[%s2042_s1] sm:$0xff]  ;;  %v1373_v14 = vmov 1   ;;  %v46_v16 = vld [vmem:[%s2041_s0 + $0xb0] sm:$0xff]  ;;  %vm688_vm4 = vcmask 15368   ;;  %vm739_vm5 = vcmask 1041409  }
   0xa   :  { %311 = vmatpush.msra.mxu0 %v1111_v6  ;;  %1325 = vmatpush.msra.mxu1 %v1111_v6  ;;  %v648_v13 = vcvt.s32.f32 %v1434_v11  ;;  %v25_v15 = vld [vmem:[%s2041_s0 + $0x8] sm:$0xff]  ;;  %v70_v17 = vld [vmem:[%s2041_s0 + $0x170] sm:$0xff]  ;;  %v59_v19 = vld [vmem:[%s2041_s0 + $0x118] sm:$0xff]  ;;  %s1375_s13 = smov [#allocation2]   ;;  %s1032_s16 = sshll.u32 %s2047_s6, 4  ;;  %s1033_s16 = int_to_ptr.hbm [resolvable:$true] %s1032_s16 }
   0xb   :  { %1327 = vmatpush.msra.mxu3 %v1111_v6  ;;  %1326 = vmatpush.msra.mxu2 %v1111_v6  ;;  %v1455_v18 = vld [vmem:[%s2042_s1 + $0x8] sm:$0xff]  ;;  %v26_v21 = vld [vmem:[%s2041_s0 + $0x10] sm:$0xff]  ;;  %v47_v22 = vld [vmem:[%s2041_s0 + $0xb8] sm:$0xff]  ;;  %s1030_s14 = sshll.u32 %s1375_s13, 4  ;;  %s1031_s14 = int_to_ptr.vmem [resolvable:$true] %s1030_s14 }
   0xc   :  { %312 = vmatpush.msra.mxu0 %v1110_v7  ;;  %1328 = vmatpush.msra.mxu1 %v1110_v7  ;;  %v649_v20 = vcvt.s32.f32 %v1455_v18  ;;  %v71_v23 = vld [vmem:[%s2041_s0 + $0x178] sm:$0xff]  ;;  %v60_v24 = vld [vmem:[%s2041_s0 + $0x120] sm:$0xff]  ;;  %v61_v28 = vld [vmem:[%s2041_s0 + $0x128] sm:$0xff] }
   0xd   :  { %1042 = vmatmul.msk.f32.vlgmr.msra.gmra.mxu0 %vm100_vm1, %v24_v8  ;;  %1063 = vmatmul.msk.f32.vlgmr.msra.gmra.mxu1 %vm100_vm1, %v45_v9  ;;  %v27_v25 = vld [vmem:[%s2041_s0 + $0x18] sm:$0xff]  ;;  %v48_v26 = vld [vmem:[%s2041_s0 + $0xc0] sm:$0xff]  ;;  %v49_v30 = vld [vmem:[%s2041_s0 + $0xc8] sm:$0xff] }
   0xe   :  { %1330 = vmatpush.msra.mxu3 %v1110_v7  ;;  %1335 = vset.pattern.permute.xlu0 %v1372_v12  ;;  %v72_v27 = vld [vmem:[%s2041_s0 + $0x180] sm:$0xff]  ;;  %v73_v31 = vld [vmem:[%s2041_s0 + $0x188] sm:$0xff]  ;;  %v62_v32 = vld [vmem:[%s2041_s0 + $0x130] sm:$0xff] }
   0xf   :  { %1087 = vmatmul.msk.f32.vlgmr.msra.gmra.mxu3 %vm100_vm1, %v69_v10  ;;  %653 = vperm.xlu0 %1335, %v1434_v11   ;;  %v28_v29 = vld [vmem:[%s2041_s0 + $0x20] sm:$0xff]  ;;  %v29_v33 = vld [vmem:[%s2041_s0 + $0x28] sm:$0xff]  ;;  %v50_v34 = vld [vmem:[%s2041_s0 + $0xd0] sm:$0xff] }
  0x10   :  { %1336 = vset.pattern.permute.xlu1 %v1373_v14  ;;  %1329 = vmatpush.msra.mxu2 %v1110_v7  ;;  %v74_v35 = vld [vmem:[%s2041_s0 + $0x190] sm:$0xff]  ;;  %v63_v36 = vld [vmem:[%s2041_s0 + $0x138] sm:$0xff]  ;;  %v64_v41 = vld [vmem:[%s2041_s0 + $0x140] sm:$0xff] }
  0x11   :  { %666 = vperm.xlu1 %1336, %v648_v13   ;;  %1337 = vset.pattern.permute.xlu2 %v1373_v14  ;;  %v30_v37 = vld [vmem:[%s2041_s0 + $0x30] sm:$0xff]  ;;  %v51_v38 = vld [vmem:[%s2041_s0 + $0xd8] sm:$0xff]  ;;  %v52_v44 = vld [vmem:[%s2041_s0 + $0xe0] sm:$0xff] }
  0x12   :  { %1077 = vmatmul.msk.f32.vlgmr.msra.gmra.mxu2 %vm100_vm1, %v59_v19  ;;  %v75_v39 = vld [vmem:[%s2041_s0 + $0x198] sm:$0xff]  ;;  %v76_v45 = vld [vmem:[%s2041_s0 + $0x1a0] sm:$0xff]  ;;  %v65_v47 = vld [vmem:[%s2041_s0 + $0x148] sm:$0xff] }
  0x13   :  { %v1284_v40 = vld [vmem:[%s2045_s4 + $0x78] sm:$0xff]   ;;  %v32_v48 = vld [vmem:[%s2041_s0 + $0x40] sm:$0xff]  ;;  %v53_v49 = vld [vmem:[%s2041_s0 + $0xe8] sm:$0xff] }
  0x14   :  { %v1147_v42 = vunpack.c.h.bf16 %v1284_v40  ;;  %v31_v43 = vld [vmem:[%s2041_s0 + $0x38] sm:$0xff]  ;;  %v1146_v46 = vunpack.c.l.bf16 %v1284_v40  ;;  %v77_v50 = vld [vmem:[%s2041_s0 + $0x1a8] sm:$0xff]  ;;  %v1283_v51 = vld [vmem:[%s2045_s4 + $0x70] sm:$0xff]  }
  0x15   :  { %1043 = vmatmul.msk.f32.gmra.mxu0 %vm100_vm1, %v25_v15  ;;  %1064 = vmatmul.msk.f32.gmra.mxu1 %vm100_vm1, %v46_v16  ;;  %v66_v52 = vld [vmem:[%s2041_s0 + $0x150] sm:$0xff]  ;;  %v1143_v53 = vunpack.c.h.bf16 %v1283_v51  ;;  %v33_v54 = vld [vmem:[%s2041_s0 + $0x48] sm:$0xff]  ;;  %v1142_v57 = vunpack.c.l.bf16 %v1283_v51  ;;  %v67_v58 = vld [vmem:[%s2041_s0 + $0x158] sm:$0xff] }
  0x16   :  { %742 = vmatpush.msrb.mxu1 %v1147_v42  ;;  %v54_v55 = vld [vmem:[%s2041_s0 + $0xf0] sm:$0xff]  ;;  %v55_v60 = vld [vmem:[%s2041_s0 + $0xf8] sm:$0xff]  ;;  %v1282_v62 = vld [vmem:[%s2045_s4 + $0x68] sm:$0xff]  }
  0x17   :  { %1088 = vmatmul.msk.f32.gmra.mxu3 %vm100_vm1, %v70_v17  ;;  %656 = vperm.xlu0 %1335, %v1455_v18   ;;  %v78_v56 = vld [vmem:[%s2041_s0 + $0x1b0] sm:$0xff]  ;;  %v79_v61 = vld [vmem:[%s2041_s0 + $0x1b8] sm:$0xff]  ;;  %v68_v63 = vld [vmem:[%s2041_s0 + $0x160] sm:$0xff]  ;;  %v1139_v0 = vunpack.c.h.bf16 %v1282_v62  ;;  %v1138_v1 = vunpack.c.l.bf16 %v1282_v62 }
  0x18   :  { %743 = vmatpush.msrb.mxu1 %v1146_v46  ;;  %v34_v59 = vld [vmem:[%s2041_s0 + $0x50] sm:$0xff]  ;;  %v35_v2 = vld [vmem:[%s2041_s0 + $0x58] sm:$0xff]  ;;  %v56_v3 = vld [vmem:[%s2041_s0 + $0x100] sm:$0xff] }
  0x19   :  { %671 = vperm.xlu1 %1336, %v649_v20   ;;  %v80_v4 = vld [vmem:[%s2041_s0 + $0x1c0] sm:$0xff]  ;;  %v57_v6 = vld [vmem:[%s2041_s0 + $0x108] sm:$0xff]  ;;  %v58_v12 = vld [vmem:[%s2041_s0 + $0x110] sm:$0xff] }
  0x1a   :  { %1078 = vmatmul.msk.f32.gmra.mxu2 %vm100_vm1, %v60_v24  ;;  %744 = vmatpush.msrb.mxu1 %v1143_v53  ;;  %v36_v5 = vld [vmem:[%s2041_s0 + $0x60] sm:$0xff]  ;;  %v81_v7 = vld [vmem:[%s2041_s0 + $0x1c8] sm:$0xff]  ;;  %v1280_v16 = vld [vmem:[%s2045_s4 + $0x58] sm:$0xff]  }
  0x1b   :  { %v1281_v8 = vld [vmem:[%s2045_s4 + $0x60] sm:$0xff]   ;;  %v37_v10 = vld [vmem:[%s2041_s0 + $0x68] sm:$0xff]  ;;  %v1131_v17 = vunpack.c.h.bf16 %v1280_v16  ;;  %v38_v19 = vld [vmem:[%s2041_s0 + $0x70] sm:$0xff] }
  0x1c   :  { %745 = vmatpush.msrb.mxu1 %v1142_v57  ;;  %v1135_v9 = vunpack.c.h.bf16 %v1281_v8  ;;  %v1134_v15 = vunpack.c.l.bf16 %v1281_v8  ;;  %v85_v40 = vld [vmem:[%s2041_s0 + $0x1e8] sm:$0xff] }
  0x1d   :  { %1044 = vmatmul.msk.f32.gmra.mxu0 %vm100_vm1, %v26_v21  ;;  %1065 = vmatmul.msk.f32.gmra.mxu1 %vm100_vm1, %v47_v22  ;;  %v83_v21 = vld [vmem:[%s2041_s0 + $0x1d8] sm:$0xff]  ;;  %v1130_v22 = vunpack.c.l.bf16 %v1280_v16 }
  0x1e   :  { %746 = vmatpush.msrb.mxu1 %v1139_v0 }
  0x1f   :  { %1089 = vmatmul.msk.f32.gmra.mxu3 %vm100_vm1, %v71_v23  ;;  %1338 = vset.pattern.permute.xlu0 %v1373_v14  ;;  %v82_v14 = vld [vmem:[%s2041_s0 + $0x1d0] sm:$0xff]  ;;  %v650_v23 = vlaneseq }
  0x20   :  { %747 = vmatpush.msrb.mxu1 %v1138_v1  ;;  %v696_v1 = vsel %vm688_vm4, %v649_v20, 0.0  ;;  %v42_v20 = vld [vmem:[%s2041_s0 + $0x90] sm:$0xff] }
  0x21   :  { %v651_v24 = vand.u32 127, %v650_v23 }
  0x22   :  { %1079 = vmatmul.msk.f32.gmra.mxu2 %vm100_vm1, %v61_v28  ;;  %748 = vmatpush.msrb.mxu1 %v1135_v9 }
  0x24   :  { %749 = vmatpush.msrb.mxu1 %v1134_v15 }
  0x25   :  { %1045 = vmatmul.msk.f32.gmra.mxu0 %vm100_vm1, %v27_v25  ;;  %1066 = vmatmul.msk.f32.gmra.mxu1 %vm100_vm1, %v48_v26  ;;  %v39_v26 = vld [vmem:[%s2041_s0 + $0x78] sm:$0xff] }
  0x26   :  { %750 = vmatpush.msrb.mxu1 %v1131_v17 }
  0x27   :  { %1090 = vmatmul.msk.f32.gmra.mxu3 %vm100_vm1, %v72_v27  ;;  %v84_v27 = vld [vmem:[%s2041_s0 + $0x1e0] sm:$0xff] }
  0x28   :  { %751 = vmatpush.msrb.mxu1 %v1130_v22 }
  0x2a   :  { %1080 = vmatmul.msk.f32.gmra.mxu2 %vm100_vm1, %v62_v32 }
  0x2d   :  { %1046 = vmatmul.msk.f32.gmra.mxu0 %vm100_vm1, %v28_v29  ;;  %1067 = vmatmul.msk.f32.gmra.mxu1 %vm100_vm1, %v49_v30  ;;  %v1279_v29 = vld [vmem:[%s2045_s4 + $0x50] sm:$0xff]   ;;  %v1374_v30 = vmov 0.0  }
  0x2e   :  { %v1127_v32 = vunpack.c.h.bf16 %v1279_v29 }
  0x2f   :  { %1091 = vmatmul.msk.f32.gmra.mxu3 %vm100_vm1, %v73_v31 }
  0x30   :  { %752 = vmatpush.msrb.mxu1 %v1127_v32 }
  0x32   :  { %1081 = vmatmul.msk.f32.gmra.mxu2 %vm100_vm1, %v63_v36 }
  0x35   :  { %1047 = vmatmul.msk.f32.gmra.mxu0 %vm100_vm1, %v29_v33  ;;  %1068 = vmatmul.msk.f32.gmra.mxu1 %vm100_vm1, %v50_v34 }
  0x37   :  { %1092 = vmatmul.msk.f32.gmra.mxu3 %vm100_vm1, %v74_v35 }
  0x3a   :  { %1082 = vmatmul.msk.f32.gmra.mxu2 %vm100_vm1, %v64_v41 }
  0x3d   :  { %1048 = vmatmul.msk.f32.gmra.mxu0 %vm100_vm1, %v30_v37  ;;  %1069 = vmatmul.msk.f32.gmra.mxu1 %vm100_vm1, %v51_v38  ;;  %v40_v37 = vld [vmem:[%s2041_s0 + $0x80] sm:$0xff] }
  0x3f   :  { %1093 = vmatmul.msk.f32.gmra.mxu3 %vm100_vm1, %v75_v39  ;;  %v1688_v39 = vld [vmem:[%s2046_s5] ss:$0 sm:$0xff] }
  0x42   :  { %1083 = vmatmul.msk.f32.gmra.mxu2 %vm100_vm1, %v65_v47  ;;  %v1126_v47 = vunpack.c.l.bf16 %v1279_v29 }
  0x44   :  { %753 = vmatpush.msrb.mxu1 %v1126_v47 }
  0x45   :  { %1049 = vmatmul.msk.f32.gmra.mxu0 %vm100_vm1, %v31_v43  ;;  %1070 = vmatmul.msk.f32.gmra.mxu1 %vm100_vm1, %v52_v44 }
  0x47   :  { %1094 = vmatmul.msk.f32.gmra.mxu3 %vm100_vm1, %v76_v45 }
  0x4a   :  { %1084 = vmatmul.msk.f32.gmra.mxu2 %vm100_vm1, %v66_v52 }
  0x4d   :  { %1050 = vmatmul.msk.f32.gmra.mxu0 %vm100_vm1, %v32_v48  ;;  %1071 = vmatmul.msk.f32.gmra.mxu1 %vm100_vm1, %v53_v49  ;;  %v689_v48 = vsel %vm688_vm4, %v648_v13, 0.0 }
  0x4f   :  { %1095 = vmatmul.msk.f32.gmra.mxu3 %vm100_vm1, %v77_v50 }
  0x52   :  { %1085 = vmatmul.msk.f32.gmra.mxu2 %vm100_vm1, %v67_v58 }
  0x55   :  { %1051 = vmatmul.msk.f32.gmra.mxu0 %vm100_vm1, %v33_v54  ;;  %1072 = vmatmul.msk.f32.gmra.mxu1 %vm100_vm1, %v54_v55  ;;  %v41_v54 = vld [vmem:[%s2041_s0 + $0x88] sm:$0xff] }
  0x56   :  { %v1278_v55 = vld [vmem:[%s2045_s4 + $0x48] sm:$0xff]  }
  0x57   :  { %1096 = vmatmul.msk.f32.gmra.mxu3 %vm100_vm1, %v78_v56  ;;  %v690_v56 = vrot.slane %v689_v48, 4  ;;  %v1122_v0 = vunpack.c.l.bf16 %v1278_v55 }
  0x5a   :  { %1086 = vmatmul.msk.f32.gmra.mxu2 %vm100_vm1, %v68_v63 }
  0x5d   :  { %1052 = vmatmul.msk.f32.gmra.mxu0 %vm100_vm1, %v34_v59  ;;  %1073 = vmatmul.msk.f32.gmra.mxu1 %vm100_vm1, %v55_v60  ;;  %v86_v59 = vld [vmem:[%s2041_s0 + $0x1f0] sm:$0xff]  ;;  %v1123_v60 = vunpack.c.h.bf16 %v1278_v55 }
  0x5f   :  { %1097 = vmatmul.msk.f32.gmra.mxu3 %vm100_vm1, %v79_v61  ;;  %754 = vmatpush.msrb.mxu1 %v1123_v60 }
  0x61   :  { %755 = vmatpush.msrb.mxu1 %v1122_v0 }
  0x65   :  { %1053 = vmatmul.msk.f32.gmra.mxu0 %vm100_vm1, %v35_v2  ;;  %1074 = vmatmul.msk.f32.gmra.mxu1 %vm100_vm1, %v56_v3  ;;  %v1277_v2 = vld [vmem:[%s2045_s4 + $0x40] sm:$0xff]   ;;  %v691_v3 = vadd.f32 %v690_v56, %v689_v48 }
  0x66   :  { %v1118_v8 = vunpack.c.l.bf16 %v1277_v2 }
  0x67   :  { %1098 = vmatmul.msk.f32.gmra.mxu3 %vm100_vm1, %v80_v4  ;;  %v692_v17 = vrot.slane %v691_v3, 2 }
  0x69   :  { %v693_v23 = vadd.f32 %v692_v17, %v691_v3 }
  0x6d   :  { %1054 = vmatmul.msk.f32.gmra.mxu0 %vm100_vm1, %v36_v5  ;;  %1075 = vmatmul.msk.f32.gmra.mxu1 %vm100_vm1, %v57_v6  ;;  %v1119_v6 = vunpack.c.h.bf16 %v1277_v2 }
  0x6f   :  { %1099 = vmatmul.msk.f32.gmra.mxu3 %vm100_vm1, %v81_v7  ;;  %v697_v7 = vrot.slane %v696_v1, 4  ;;  %756 = vmatpush.msrb.mxu1 %v1119_v6 }
  0x71   :  { %757 = vmatpush.msrb.mxu1 %v1118_v8 }
  0x75   :  { %1055 = vmatmul.msk.f32.gmra.mxu0 %vm100_vm1, %v37_v10  ;;  %1076 = vmatmul.msk.f32.gmra.mxu1 %vm100_vm1, %v58_v12 }
  0x77   :  { %1100 = vmatmul.msk.f32.gmra.mxu3 %vm100_vm1, %v82_v14 }
  0x7d   :  { %1056 = vmatmul.msk.f32.gmra.mxu0 %vm100_vm1, %v38_v19  ;;  %v87_v19 = vld [vmem:[%s2041_s0 + $0x1f8] sm:$0xff] }
  0x7f   :  { %1101 = vmatmul.msk.f32.gmra.mxu3 %vm100_vm1, %v83_v21  ;;  %v698_v21 = vadd.f32 %v697_v7, %v696_v1 }
  0x81   :  { %v654_v25 = vpop.permute.xlu0 %653 }
  0x82   :  { %vm658_vm2 = vcmp.eq.s32.totalorder %v654_v25, %v651_v24  ;;  %v694_v25 = vrot.slane %v693_v23, 1 }
  0x83   :  { %v667_v28 = vpop.permute.xlu1 %666  ;;  %v1106_v31 = vsel %vm658_vm2, 1.0, %v1374_v30 }
  0x84   :  { %v674_v33 = vmul.f32 %v1106_v31, %v667_v28 }
  0x85   :  { %1057 = vmatmul.msk.f32.gmra.mxu0 %vm100_vm1, %v39_v26  ;;  %v699_v26 = vrot.slane %v698_v21, 2 }
  0x86   :  { %v676_v38 = vrot.slane %v674_v33, 4 }
  0x87   :  { %1102 = vmatmul.msk.f32.gmra.mxu3 %vm100_vm1, %v84_v27  ;;  %v695_v27 = vadd.f32 %v694_v25, %v693_v23 }
  0x88   :  { %v677_v43 = vadd.f32 %v676_v38, %v674_v33 }
  0x89   :  { %v657_v34 = vpop.permute.xlu0 %656  ;;  %v703_v33 = vmax.f32 %v695_v27, 1.0 }
  0x8a   :  { %v314_v35 = vpop.f32.mrf.mxu0  ;;  %v1680_v36 = vpop.f32.mrf.mxu1  ;;  %vm659_vm3 = vcmp.eq.s32.totalorder %v657_v34, %v651_v24  ;;  %v678_v45 = vrot.slane %v677_v43, 2 }
  0x8b   :  { %v1107_v41 = vsel %vm659_vm3, 1.0, %v1374_v30  ;;  %v672_v42 = vpop.permute.xlu1 %671  ;;  %v315_v49 = vadd.f32 %v1688_v39, %v314_v35  ;;  %v43_v30 = vld [vmem:[%s2041_s0 + $0x98] sm:$0xff]  ;;  %764 = vperm.xlu2 %1337, %v703_v33  }
  0x8c   :  { %v675_v44 = vmul.f32 %v1107_v41, %v672_v42  ;;  %v679_v50 = vadd.f32 %v678_v45, %v677_v43 }
  0x8d   :  { %1058 = vmatmul.msk.f32.gmra.mxu0 %vm100_vm1, %v40_v37  ;;  %v506_v58 = vmax.f32 %v315_v49, 0.0  ;;  %v700_v37 = vadd.f32 %v699_v26, %v698_v21 }
  0x8e   :  { %v682_v46 = vrot.slane %v675_v44, 4  ;;  %v680_v62 = vrot.slane %v679_v50, 1 }
  0x8f   :  { %1103 = vmatmul.msk.f32.gmra.mxu3 %vm100_vm1, %v85_v40  ;;  %v701_v40 = vrot.slane %v700_v37, 1 }
  0x90   :  { %v683_v51 = vadd.f32 %v682_v46, %v675_v44  ;;  %v681_v9 = vadd.f32 %v680_v62, %v679_v50  ;;  %v44_v44 = vld [vmem:[%s2041_s0 + $0xa0] sm:$0xff] }
  0x91   :  { %v702_v41 = vadd.f32 %v701_v40, %v700_v37 }
  0x92   :  { %v317_v52 = vpop.f32.mrf.mxu0  ;;  %v1699_v53 = vpop.f32.mrf.mxu1  ;;  %v684_v57 = vrot.slane %v683_v51, 2 }
  0x93   :  { %v318_v11 = vadd.f32 %v1688_v39, %v317_v52  ;;  %v1708_v13 = vpop.f32.mrf.mxu3  ;;  %v704_v47 = vmax.f32 %v702_v41, 1.0 }
  0x94   :  { %v685_v63 = vadd.f32 %v684_v57, %v683_v51 }
  0x95   :  { %v507_v61 = vmax.f32 %v318_v11, 0.0  ;;  %1059 = vmatmul.msk.f32.gmra.mxu0 %vm100_vm1, %v41_v54  ;;  %v1744_v35 = vpop.f32.mrf.mxu2  ;;  %768 = vperm.xlu2 %1337, %v704_v47  }
  0x96   :  { %v686_v5 = vrot.slane %v685_v63, 1 }
  0x97   :  { %v570_v4 = vadd.f32 %v507_v61, %v506_v58  ;;  %1104 = vmatmul.msk.f32.gmra.mxu3 %vm100_vm1, %v86_v59 }
  0x98   :  { %v687_v10 = vadd.f32 %v686_v5, %v685_v63 }
  0x9a   :  { %v320_v12 = vpop.f32.mrf.mxu0  ;;  %v1721_v18 = vpop.f32.mrf.mxu1  ;;  %v740_v16 = vsel %vm739_vm5, %v687_v10, %v681_v9 }
  0x9b   :  { %v321_v14 = vadd.f32 %v1688_v39, %v320_v12  ;;  %v1727_v15 = vpop.f32.mrf.mxu3  ;;  %758 = vmatmul.f32.vlgmr.msrb.gmra.mxu1 %v740_v16 }
  0x9d   :  { %v508_v22 = vmax.f32 %v321_v14, 0.0  ;;  %1060 = vmatmul.msk.f32.gmra.mxu0 %vm100_vm1, %v42_v20  ;;  %v422_v50 = vpop.f32.mrf.mxu2 }
  0x9f   :  { %v571_v24 = vadd.f32 %v570_v4, %v508_v22  ;;  %1105 = vmatmul.msk.f32.gmra.mxu3 %vm100_vm1, %v87_v19 }
  0xa2   :  { %v323_v28 = vpop.f32.mrf.mxu0  ;;  %v1735_v29 = vpop.f32.mrf.mxu1 }
  0xa3   :  { %v324_v31 = vadd.f32 %v1688_v39, %v323_v28  ;;  %v1741_v32 = vpop.f32.mrf.mxu3 }
  0xa5   :  { %v509_v34 = vmax.f32 %v324_v31, 0.0  ;;  %1061 = vmatmul.msk.f32.gmra.mxu0 %vm100_vm1, %v43_v30  ;;  %v425_v57 = vpop.f32.mrf.mxu2 }
  0xa7   :  { %v572_v38 = vadd.f32 %v571_v24, %v509_v34 }
  0xaa   :  { %v326_v42 = vpop.f32.mrf.mxu0  ;;  %v1746_v43 = vpop.f32.mrf.mxu1 }
  0xab   :  { %v327_v45 = vadd.f32 %v1688_v39, %v326_v42  ;;  %v1752_v46 = vpop.f32.mrf.mxu3 }
  0xad   :  { %v510_v48 = vmax.f32 %v327_v45, 0.0  ;;  %1062 = vmatmul.msk.f32.gmra.mxu0 %vm100_vm1, %v44_v44  ;;  %v428_v4 = vpop.f32.mrf.mxu2 }
  0xaf   :  { %v573_v49 = vadd.f32 %v572_v38, %v510_v48 }
  0xb2   :  { %v329_v51 = vpop.f32.mrf.mxu0  ;;  %v1755_v52 = vpop.f32.mrf.mxu1 }
  0xb3   :  { %v330_v54 = vadd.f32 %v1688_v39, %v329_v51  ;;  %v1758_v55 = vpop.f32.mrf.mxu3 }
  0xb5   :  { %v511_v56 = vmax.f32 %v330_v54, 0.0  ;;  %v431_v20 = vpop.f32.mrf.mxu2 }
  0xb7   :  { %v574_v11 = vadd.f32 %v573_v49, %v511_v56  ;;  %v420_v49 = vadd.f32 %v1688_v39, %v1744_v35  ;;  %v1291_v35 = vld [vmem:[%s2045_s4 + $0x38] sm:$0xff]  }
  0xba   :  { %v332_v58 = vpop.f32.mrf.mxu0  ;;  %v1760_v59 = vpop.f32.mrf.mxu1 }
  0xbb   :  { %v333_v60 = vadd.f32 %v1688_v39, %v332_v58  ;;  %v1763_v61 = vpop.f32.mrf.mxu3 }
  0xbd   :  { %v512_v62 = vmax.f32 %v333_v60, 0.0  ;;  %v434_v24 = vpop.f32.mrf.mxu2 }
  0xbf   :  { %v575_v63 = vadd.f32 %v574_v11, %v512_v62  ;;  %v423_v11 = vadd.f32 %v1688_v39, %v422_v50  ;;  %v541_v62 = vmax.f32 %v420_v49, 0.0  ;;  %v432_v50 = vadd.f32 %v1688_v39, %v431_v20 }
  0xc2   :  { %v335_v0 = vpop.f32.mrf.mxu0  ;;  %v1765_v1 = vpop.f32.mrf.mxu1 }
  0xc3   :  { %v336_v2 = vadd.f32 %v1688_v39, %v335_v0  ;;  %v1768_v3 = vpop.f32.mrf.mxu3 }
  0xc5   :  { %v513_v5 = vmax.f32 %v336_v2, 0.0  ;;  %v437_v28 = vpop.f32.mrf.mxu2  ;;  %v542_v2 = vmax.f32 %v423_v11, 0.0 }
  0xc7   :  { %v576_v6 = vadd.f32 %v575_v63, %v513_v5  ;;  %v426_v63 = vadd.f32 %v1688_v39, %v425_v57  ;;  %v429_v5 = vadd.f32 %v1688_v39, %v428_v4  ;;  %v438_v4 = vadd.f32 %v1688_v39, %v437_v28 }
  0xc9   :  { %v544_v57 = vmax.f32 %v429_v5, 0.0 }
  0xca   :  { %v338_v7 = vpop.f32.mrf.mxu0  ;;  %v1770_v8 = vpop.f32.mrf.mxu1 }
  0xcb   :  { %v339_v9 = vadd.f32 %v1688_v39, %v338_v7  ;;  %v1773_v10 = vpop.f32.mrf.mxu3 }
  0xcd   :  { %v514_v12 = vmax.f32 %v339_v9, 0.0  ;;  %v440_v42 = vpop.f32.mrf.mxu2  ;;  %v1179_v9 = vunpack.c.h.bf16 %v1291_v35 }
  0xcf   :  { %v577_v14 = vadd.f32 %v576_v6, %v514_v12  ;;  %v543_v12 = vmax.f32 %v426_v63, 0.0  ;;  %839 = vmatpush.msrb.mxu2 %v1179_v9  ;;  %v456_v9 = vadd.f32 %v1688_v39, %v1741_v32 }
  0xd2   :  { %v341_v16 = vpop.f32.mrf.mxu0  ;;  %v1775_v17 = vpop.f32.mrf.mxu1 }
  0xd3   :  { %v342_v19 = vadd.f32 %v1688_v39, %v341_v16  ;;  %v1778_v21 = vpop.f32.mrf.mxu3 }
  0xd5   :  { %v515_v22 = vmax.f32 %v342_v19, 0.0  ;;  %v443_v60 = vpop.f32.mrf.mxu2  ;;  %v435_v19 = vadd.f32 %v1688_v39, %v434_v24 }
  0xd6   :  { %v444_v20 = vadd.f32 %v1688_v39, %v443_v60  ;;  %v1178_v60 = vunpack.c.l.bf16 %v1291_v35 }
  0xd7   :  { %v1780_v23 = vadd.f32 %v577_v14, %v515_v22 }
  0xd8   :  { %840 = vmatpush.msrb.mxu2 %v1178_v60 }
  0xda   :  { %v1782_v25 = vpop.f32.mrf.mxu0  ;;  %v1784_v26 = vpop.f32.mrf.mxu1 }
  0xdb   :  { %v1786_v27 = vpop.f32.mrf.mxu3 }
  0xe2   :  { %v1788_v30 = vpop.f32.mrf.mxu0  ;;  %v410_v31 = vpop.f32.mrf.mxu1 }
  0xe3   :  { %v1790_v33 = vpop.f32.mrf.mxu3  ;;  %v411_v38 = vadd.f32 %v1688_v39, %v410_v31  ;;  %v545_v31 = vmax.f32 %v432_v50, 0.0 }
  0xe5   :  { %v538_v44 = vmax.f32 %v411_v38, 0.0 }
  0xea   :  { %v1792_v34 = vpop.f32.mrf.mxu0  ;;  %v413_v37 = vpop.f32.mrf.mxu1 }
  0xeb   :  { %v414_v40 = vadd.f32 %v1688_v39, %v413_v37  ;;  %v1796_v41 = vpop.f32.mrf.mxu3  ;;  %v441_v37 = vadd.f32 %v1688_v39, %v440_v42  ;;  %v450_v42 = vadd.f32 %v1688_v39, %v1708_v13  ;;  %v1290_v13 = vld [vmem:[%s2045_s4 + $0x30] sm:$0xff]  }
  0xed   :  { %v539_v45 = vmax.f32 %v414_v40, 0.0  ;;  %v446_v40 = vpop.f32.mrf.mxu2 }
  0xee   :  { %v447_v11 = vadd.f32 %v1688_v39, %v446_v40 }
  0xef   :  { %v607_v51 = vadd.f32 %v539_v45, %v538_v44  ;;  %v546_v44 = vmax.f32 %v435_v19, 0.0  ;;  %v547_v45 = vmax.f32 %v438_v4, 0.0  ;;  %v1289_v4 = vld [vmem:[%s2045_s4 + $0x28] sm:$0xff]  }
  0xf0   :  { %v550_v63 = vmax.f32 %v447_v11, 0.0  ;;  %v1171_v32 = vunpack.c.h.bf16 %v1289_v4  ;;  %v1170_v40 = vunpack.c.l.bf16 %v1289_v4 }
  0xf2   :  { %v1798_v47 = vpop.f32.mrf.mxu0  ;;  %v416_v48 = vpop.f32.mrf.mxu1 }
  0xf3   :  { %v417_v54 = vadd.f32 %v1688_v39, %v416_v48  ;;  %v1803_v56 = vpop.f32.mrf.mxu3 }
  0xf5   :  { %v540_v58 = vmax.f32 %v417_v54, 0.0 }
  0xf7   :  { %v608_v0 = vadd.f32 %v607_v51, %v540_v58  ;;  %v548_v51 = vmax.f32 %v441_v37, 0.0  ;;  %v549_v58 = vmax.f32 %v444_v20, 0.0 }
  0xf9   :  { %v609_v6 = vadd.f32 %v608_v0, %v541_v62  ;;  %v453_v0 = vadd.f32 %v1688_v39, %v1727_v15  ;;  %v459_v15 = vadd.f32 %v1688_v39, %v1752_v46  ;;  %v465_v46 = vadd.f32 %v1688_v39, %v1763_v61 }
  0xfa   :  { %v1811_v7 = vpop.f32.mrf.mxu0  ;;  %v471_v61 = vadd.f32 %v1688_v39, %v1773_v10 }
  0xfb   :  { %v610_v14 = vadd.f32 %v609_v6, %v542_v2  ;;  %v1814_v16 = vpop.f32.mrf.mxu3  ;;  %v551_v6 = vmax.f32 %v450_v42, 0.0  ;;  %v552_v19 = vmax.f32 %v453_v0, 0.0  ;;  %v556_v42 = vmax.f32 %v465_v46, 0.0 }
  0xfc   :  { %v486_v46 = vadd.f32 %v1688_v39, %v1803_v56 }
  0xfd   :  { %v611_v22 = vadd.f32 %v610_v14, %v543_v12  ;;  %v1175_v14 = vunpack.c.h.bf16 %v1290_v13 }
  0xff   :  { %v612_v38 = vadd.f32 %v611_v22, %v544_v57  ;;  %v1174_v57 = vunpack.c.l.bf16 %v1290_v13  ;;  %841 = vmatpush.msrb.mxu2 %v1175_v14  ;;  %v553_v22 = vmax.f32 %v456_v9, 0.0  ;;  %v477_v9 = vadd.f32 %v1688_v39, %v1786_v27 }
 0x101   :  { %v613_v48 = vadd.f32 %v612_v38, %v545_v31  ;;  %v462_v31 = vadd.f32 %v1688_v39, %v1758_v55  ;;  %v1288_v38 = vld [vmem:[%s2045_s4 + $0x20] sm:$0xff]   ;;  %842 = vmatpush.msrb.mxu2 %v1174_v57  ;;  %v468_v55 = vadd.f32 %v1688_v39, %v1768_v3  ;;  %v474_v3 = vadd.f32 %v1688_v39, %v1778_v21 }
 0x102   :  { %v1820_v49 = vpop.f32.mrf.mxu0  ;;  %v357_v21 = vadd.f32 %v1688_v39, %v1811_v7 }
 0x103   :  { %v614_v54 = vadd.f32 %v613_v48, %v546_v44  ;;  %v1823_v24 = vpop.f32.mrf.mxu3  ;;  %v554_v44 = vmax.f32 %v459_v15, 0.0  ;;  %v345_v48 = vadd.f32 %v1688_v39, %v1782_v25  ;;  %843 = vmatpush.msrb.mxu2 %v1171_v32  ;;  %v557_v0 = vmax.f32 %v468_v55, 0.0 }
 0x104   :  { %v360_v27 = vadd.f32 %v1688_v39, %v1820_v49  ;;  %v560_v32 = vmax.f32 %v477_v9, 0.0  ;;  %v492_v56 = vadd.f32 %v1688_v39, %v1823_v24 }
 0x105   :  { %v615_v28 = vadd.f32 %v614_v54, %v547_v45  ;;  %v555_v54 = vmax.f32 %v462_v31, 0.0  ;;  %844 = vmatpush.msrb.mxu2 %v1170_v40  ;;  %v516_v25 = vmax.f32 %v345_v48, 0.0  ;;  %v1166_v31 = vunpack.c.l.bf16 %v1288_v38 }
 0x106   :  { %v520_v40 = vmax.f32 %v357_v21, 0.0 }
 0x107   :  { %v616_v62 = vadd.f32 %v615_v28, %v548_v51  ;;  %v1167_v51 = vunpack.c.h.bf16 %v1288_v38  ;;  %v579_v13 = vadd.f32 %v1780_v23, %v516_v25  ;;  %v483_v23 = vadd.f32 %v1688_v39, %v1796_v41 }
 0x108   :  { %v489_v38 = vadd.f32 %v1688_v39, %v1814_v16 }
 0x109   :  { %v617_v2 = vadd.f32 %v616_v62, %v549_v58  ;;  %v348_v58 = vadd.f32 %v1688_v39, %v1788_v30  ;;  %845 = vmatpush.msrb.mxu2 %v1167_v51  ;;  %v354_v30 = vadd.f32 %v1688_v39, %v1798_v47  ;;  %v521_v51 = vmax.f32 %v360_v27, 0.0 }
 0x10a   :  { %v1829_v5 = vpop.f32.mrf.mxu0 }
 0x10b   :  { %v618_v12 = vadd.f32 %v617_v2, %v550_v63  ;;  %v1833_v50 = vpop.f32.mrf.mxu3  ;;  %v351_v63 = vadd.f32 %v1688_v39, %v1792_v34  ;;  %v517_v60 = vmax.f32 %v348_v58, 0.0  ;;  %v480_v34 = vadd.f32 %v1688_v39, %v1790_v33  ;;  %v1287_v33 = vld [vmem:[%s2045_s4 + $0x18] sm:$0xff]   ;;  %846 = vmatpush.msrb.mxu2 %v1166_v31  ;;  %v1286_v31 = vld [vmem:[%s2045_s4 + $0x10] sm:$0xff]  }
 0x10c   :  { %v519_v4 = vmax.f32 %v354_v30, 0.0  ;;  %v363_v49 = vadd.f32 %v1688_v39, %v1829_v5  ;;  %v1162_v48 = vunpack.c.l.bf16 %v1287_v33  ;;  %v495_v5 = vadd.f32 %v1688_v39, %v1833_v50 }
 0x10d   :  { %v619_v35 = vadd.f32 %v618_v12, %v551_v6  ;;  %v558_v6 = vmax.f32 %v471_v61, 0.0  ;;  %v765_v12 = vpop.permute.xlu2 %764  ;;  %v518_v14 = vmax.f32 %v351_v63, 0.0  ;;  %v580_v47 = vadd.f32 %v579_v13, %v517_v60 }
 0x10e   :  { %v563_v61 = vmax.f32 %v486_v46, 0.0  ;;  %v566_v50 = vmax.f32 %v495_v5, 0.0 }
 0x10f   :  { %v620_v37 = vadd.f32 %v619_v35, %v552_v19  ;;  %v559_v19 = vmax.f32 %v474_v3, 0.0  ;;  %v581_v7 = vadd.f32 %v580_v47, %v518_v14  ;;  %v564_v3 = vmax.f32 %v489_v38, 0.0 }
 0x111   :  { %v621_v45 = vadd.f32 %v620_v37, %v553_v22  ;;  %v561_v37 = vmax.f32 %v480_v34, 0.0  ;;  %v582_v41 = vadd.f32 %v581_v7, %v519_v4 }
 0x112   :  { %v365_v20 = vpop.f32.mrf.mxu0 }
 0x113   :  { %v622_v11 = vadd.f32 %v621_v45, %v554_v44  ;;  %v1854_v28 = vpop.f32.mrf.mxu3  ;;  %v1163_v44 = vunpack.c.h.bf16 %v1287_v33  ;;  %v583_v58 = vadd.f32 %v582_v41, %v520_v40  ;;  %v384_v40 = vadd.f32 %v1688_v39, %v1721_v18  ;;  %v1285_v41 = vld [vmem:[%s2045_s4 + $0x8] sm:$0xff]  }
 0x114   :  { %v498_v60 = vadd.f32 %v1688_v39, %v1854_v28  ;;  %v378_v28 = vadd.f32 %v1688_v39, %v1680_v36  ;;  %v1159_v36 = vunpack.c.h.bf16 %v1286_v31 }
 0x115   :  { %v623_v62 = vadd.f32 %v622_v11, %v555_v54  ;;  %v562_v54 = vmax.f32 %v483_v23, 0.0  ;;  %v366_v11 = vadd.f32 %v1688_v39, %v365_v20  ;;  %847 = vmatpush.msrb.mxu2 %v1163_v44  ;;  %v584_v16 = vadd.f32 %v583_v58, %v521_v51 }
 0x116   :  { %v527_v44 = vmax.f32 %v378_v28, 0.0  ;;  %v387_v51 = vadd.f32 %v1688_v39, %v1735_v29  ;;  %v529_v18 = vmax.f32 %v384_v40, 0.0 }
 0x117   :  { %v624_v2 = vadd.f32 %v623_v62, %v556_v42  ;;  %v522_v62 = vmax.f32 %v363_v49, 0.0  ;;  %848 = vmatpush.msrb.mxu2 %v1162_v48  ;;  %v523_v20 = vmax.f32 %v366_v11, 0.0  ;;  %v390_v11 = vadd.f32 %v1688_v39, %v1746_v43 }
 0x118   :  { %v530_v29 = vmax.f32 %v387_v51, 0.0  ;;  %v396_v43 = vadd.f32 %v1688_v39, %v1760_v59  ;;  %v402_v59 = vadd.f32 %v1688_v39, %v1770_v8  ;;  %v405_v8 = vadd.f32 %v1688_v39, %v1775_v17  ;;  %v1296_v17 = vld [vmem:[%s2045_s4 + $0xa0] sm:$0xff]  }
 0x119   :  { %v625_v10 = vadd.f32 %v624_v2, %v557_v0  ;;  %v769_v0 = vpop.permute.xlu2 %768  ;;  %849 = vmatpush.msrb.mxu2 %v1159_v36  ;;  %v1199_v36 = vunpack.c.h.bf16 %v1296_v17 }
 0x11a   :  { %v368_v57 = vpop.f32.mrf.mxu0  ;;  %v1896_v9 = vsel %vm739_vm5, %v769_v0, %v765_v12  ;;  %v531_v0 = vmax.f32 %v390_v11, 0.0  ;;  %v535_v28 = vmax.f32 %v402_v59, 0.0 }
 0x11b   :  { %v626_v15 = vadd.f32 %v625_v10, %v558_v6  ;;  %v500_v35 = vpop.f32.mrf.mxu3  ;;  %v369_v63 = vadd.f32 %v1688_v39, %v368_v57  ;;  %v565_v6 = vmax.f32 %v492_v56, 0.0  ;;  %v585_v10 = vadd.f32 %v584_v16, %v522_v62 }
 0x11c   :  { %v501_v34 = vadd.f32 %v1688_v39, %v500_v35  ;;  %1344 = vrcp.f32 %v1896_v9  ;;  %v381_v35 = vadd.f32 %v1688_v39, %v1699_v53  ;;  %v393_v62 = vadd.f32 %v1688_v39, %v1755_v52 }
 0x11d   :  { %v627_v22 = vadd.f32 %v626_v15, %v559_v19  ;;  %v524_v14 = vmax.f32 %v369_v63, 0.0  ;;  %v586_v19 = vadd.f32 %v585_v10, %v523_v20  ;;  %v567_v15 = vmax.f32 %v498_v60, 0.0  ;;  %v1299_v20 = vld [vmem:[%s2045_s4 + $0xb8] sm:$0xff]  }
 0x11e   :  { %v528_v53 = vmax.f32 %v381_v35, 0.0  ;;  %v1211_v52 = vunpack.c.h.bf16 %v1299_v20  ;;  %v533_v10 = vmax.f32 %v396_v43, 0.0  ;;  %vm777_vm6 = vweird.f32 %v1896_v9 }
 0x11f   :  { %v628_v45 = vadd.f32 %v627_v22, %v560_v32  ;;  %v587_v12 = vadd.f32 %v586_v19, %v524_v14  ;;  %v568_v32 = vmax.f32 %v501_v34, 0.0 }
 0x120   :  { %894 = vmatpush.msrb.mxu3 %v1211_v52 }
 0x121   :  { %v629_v55 = vadd.f32 %v628_v45, %v561_v37  ;;  %v1158_v45 = vunpack.c.l.bf16 %v1286_v31 }
 0x122   :  { %v371_v42 = vpop.f32.mrf.mxu0  ;;  %v1911_v48 = vpop.eup %1344 }
 0x123   :  { %v630_v25 = vadd.f32 %v629_v55, %v562_v54  ;;  %v372_v24 = vadd.f32 %v1688_v39, %v371_v42  ;;  %v503_v30 = vpop.f32.mrf.mxu3  ;;  %850 = vmatpush.msrb.mxu2 %v1158_v45  ;;  %v1155_v55 = vunpack.c.h.bf16 %v1285_v41  ;;  %v773_v58 = vmul.f32 %v1911_v48, %v1896_v9 }
 0x124   :  { %v504_v21 = vadd.f32 %v1688_v39, %v503_v30  ;;  %v1154_v42 = vunpack.c.l.bf16 %v1285_v41  ;;  %v1210_v30 = vunpack.c.l.bf16 %v1299_v20  ;;  %vm778_vm7 = vweird.f32 %v1911_v48 }
 0x125   :  { %v631_v2 = vadd.f32 %v630_v25, %v563_v61  ;;  %v525_v47 = vmax.f32 %v372_v24, 0.0  ;;  %851 = vmatpush.msrb.mxu2 %v1155_v55  ;;  %v1149_v61 = vld [vmem:[%s2045_s4] sm:$0xff]   ;;  %v774_v16 = vsub.f32 1.0, %v773_v58  ;;  %v399_v24 = vadd.f32 %v1688_v39, %v1765_v1  ;;  %v1297_v1 = vld [vmem:[%s2045_s4 + $0xa8] sm:$0xff]   ;;  %vm1955_vm8 = vmor %vm777_vm6, %vm778_vm7 }
 0x126   :  { %v569_v22 = vmax.f32 %v504_v21, 0.0  ;;  %v1151_v63 = vunpack.c.h.bf16 %v1149_v61  ;;  %v1150_v60 = vunpack.c.l.bf16 %v1149_v61  ;;  %895 = vmatpush.msrb.mxu3 %v1210_v30  ;;  %v1294_v55 = vld [vmem:[%s2045_s4 + $0x90] sm:$0xff]   ;;  %v793_v61 = vld [vmem:[%s2043_s2] sm:$0x3] }
 0x127   :  { %v632_v13 = vadd.f32 %v631_v2, %v564_v3  ;;  %v588_v7 = vadd.f32 %v587_v12, %v525_v47  ;;  %852 = vmatpush.msrb.mxu2 %v1154_v42  ;;  %v775_v21 = vmul.f32 %v1911_v48, %v774_v16  ;;  %v534_v19 = vmax.f32 %v399_v24, 0.0  ;;  %v1293_v42 = vld [vmem:[%s2045_s4 + $0x88] sm:$0xff]  }
 0x128   :  { %v1203_v12 = vunpack.c.h.bf16 %v1297_v1  ;;  %v1191_v58 = vunpack.c.h.bf16 %v1294_v55  ;;  %v795_v16 = vrot.slane %v793_v61, 1 }
 0x129   :  { %v633_v57 = vadd.f32 %v632_v13, %v565_v6  ;;  %853 = vmatpush.msrb.mxu2 %v1151_v63  ;;  %v532_v6 = vmax.f32 %v393_v62, 0.0  ;;  %v1298_v13 = vld [vmem:[%s2045_s4 + $0xb0] sm:$0xff]   ;;  %v776_v35 = vadd.f32 %v1911_v48, %v775_v21  ;;  %v1187_v63 = vunpack.c.h.bf16 %v1293_v42 }
 0x12a   :  { %v374_v4 = vpop.f32.mrf.mxu0 }
 0x12b   :  { %v634_v27 = vadd.f32 %v633_v57, %v566_v50  ;;  %v375_v23 = vadd.f32 %v1688_v39, %v374_v4  ;;  %854 = vmatpush.msrb.mxu2 %v1150_v60  ;;  %v1207_v57 = vunpack.c.h.bf16 %v1298_v13  ;;  %v408_v4 = vadd.f32 %v1688_v39, %v1784_v26 }
 0x12c   :  { %v1202_v39 = vunpack.c.l.bf16 %v1297_v1  ;;  %v536_v26 = vmax.f32 %v405_v8, 0.0  ;;  %v1305_v1 = vld [vmem:[%s2045_s4 + $0xe8] sm:$0xff]   ;;  %v1304_v8 = vld [vmem:[%s2045_s4 + $0xe0] sm:$0xff]  }
 0x12d   :  { %v635_v33 = vadd.f32 %v634_v27, %v567_v15  ;;  %v526_v37 = vmax.f32 %v375_v23, 0.0  ;;  %v1206_v15 = vunpack.c.l.bf16 %v1298_v13  ;;  %v783_v27 = vand.u32 2147483648, %v1896_v9  ;;  %896 = vmatpush.msrb.mxu3 %v1207_v57  ;;  %v1307_v13 = vld [vmem:[%s2045_s4 + $0xf8] sm:$0xff]  }
 0x12e   :  { %v1242_v21 = vunpack.c.l.bf16 %v1307_v13 }
 0x12f   :  { %v636_v46 = vadd.f32 %v635_v33, %v568_v32  ;;  %v589_v49 = vadd.f32 %v588_v7, %v526_v37  ;;  %897 = vmatpush.msrb.mxu3 %v1206_v15  ;;  %v537_v7 = vmax.f32 %v408_v4, 0.0  ;;  %v784_v37 = vor.u32 1.1754944e-38, %v783_v27  ;;  %v1303_v4 = vld [vmem:[%s2045_s4 + $0xd8] sm:$0xff]  }
 0x130   :  { %v1235_v15 = vunpack.c.h.bf16 %v1305_v1  ;;  %v1230_v27 = vunpack.c.l.bf16 %v1304_v8 }
 0x131   :  { %v590_v38 = vadd.f32 %v589_v49, %v527_v44  ;;  %v637_v54 = vadd.f32 %v636_v46, %v569_v22  ;;  %v781_v22 = vand.u32 2147483647, %v1896_v9  ;;  %898 = vmatpush.msrb.mxu3 %v1203_v12  ;;  %v780_v9 = vsel %vm1955_vm8, %v1911_v48, %v776_v35  ;;  %v1295_v46 = vld [vmem:[%s2045_s4 + $0x98] sm:$0xff]  }
 0x132   :  { %v1198_v49 = vunpack.c.l.bf16 %v1296_v17  ;;  %v1195_v51 = vunpack.c.h.bf16 %v1295_v46  ;;  %v1194_v48 = vunpack.c.l.bf16 %v1295_v46  ;;  %v1227_v12 = vunpack.c.h.bf16 %v1303_v4  ;;  %v1314_v46 = vld [vmem:[%s2045_s4 + $0x130] sm:$0xff]  }
 0x133   :  { %v591_v56 = vadd.f32 %v590_v38, %v528_v53  ;;  %v638_v5 = vrot.slane %v637_v54, 4  ;;  %vm782_vm9 = vcmp.eq.f32.partialorder %v781_v22, 8.507059e+37  ;;  %899 = vmatpush.msrb.mxu3 %v1202_v39  ;;  %v759_v53 = vpop.f32.mrf.mxu1  ;;  %v1301_v22 = vld [vmem:[%s2045_s4 + $0xc8] sm:$0xff]   ;;  %v1340_v39 = vld [vmem:[%s2046_s5 + $0x1] ss:$0 sm:$0xff] }
 0x134   :  { %v785_v41 = vsel %vm782_vm9, %v784_v37, %v780_v9  ;;  %v1219_v31 = vunpack.c.h.bf16 %v1301_v22  ;;  %v1218_v37 = vunpack.c.l.bf16 %v1301_v22  ;;  %v1315_v9 = vld [vmem:[%s2045_s4 + $0x138] sm:$0xff]  }
 0x135   :  { %v592_v25 = vadd.f32 %v591_v56, %v529_v18  ;;  %v639_v2 = vadd.f32 %v638_v5, %v637_v54  ;;  %900 = vmatpush.msrb.mxu3 %v1199_v36  ;;  %v786_v11 = vmul.f32 %v785_v41, %v759_v53  ;;  %v1300_v36 = vld [vmem:[%s2045_s4 + $0xc0] sm:$0xff]   ;;  %v1271_v53 = vunpack.c.h.bf16 %v1314_v46  ;;  %v1313_v41 = vld [vmem:[%s2045_s4 + $0x128] sm:$0xff]  }
 0x137   :  { %v593_v3 = vadd.f32 %v592_v25, %v530_v29  ;;  %v640_v34 = vrot.slane %v639_v2, 2  ;;  %901 = vmatpush.msrb.mxu3 %v1198_v49  ;;  %v1190_v29 = vunpack.c.l.bf16 %v1294_v55  ;;  %v788_v25 = vrot.slane %v786_v11, 1 }
 0x138   :  { %v1275_v49 = vunpack.c.h.bf16 %v1315_v9  ;;  %v1266_v55 = vunpack.c.l.bf16 %v1313_v41 }
 0x139   :  { %v594_v50 = vadd.f32 %v593_v3, %v531_v0  ;;  %v641_v32 = vadd.f32 %v640_v34, %v639_v2  ;;  %902 = vmatpush.msrb.mxu3 %v1195_v51  ;;  %v1292_v3 = vld [vmem:[%s2045_s4 + $0x80] sm:$0xff]   ;;  %v1186_v2 = vunpack.c.l.bf16 %v1293_v42  ;;  %v1243_v34 = vunpack.c.h.bf16 %v1307_v13 }
 0x13a   :  { %v1183_v60 = vunpack.c.h.bf16 %v1292_v3  ;;  %v1182_v30 = vunpack.c.l.bf16 %v1292_v3  ;;  %1004 = vmatpush.msra.mxu2 %v1275_v49  ;;  %v1270_v51 = vunpack.c.l.bf16 %v1314_v46  ;;  %v1308_v3 = vld [vmem:[%s2045_s4 + $0x100] sm:$0xff]  }
 0x13b   :  { %v595_v14 = vadd.f32 %v594_v50, %v532_v6  ;;  %v642_v44 = vrot.slane %v641_v32, 1  ;;  %903 = vmatpush.msrb.mxu3 %v1194_v48  ;;  %949 = vmatpush.msra.mxu1 %v1243_v34 }
 0x13d   :  { %v596_v47 = vadd.f32 %v595_v14, %v533_v10  ;;  %v643_v54 = vadd.f32 %v642_v44, %v641_v32  ;;  %904 = vmatpush.msrb.mxu3 %v1191_v58  ;;  %v1306_v14 = vld [vmem:[%s2045_s4 + $0xf0] sm:$0xff]   ;;  %950 = vmatpush.msra.mxu1 %v1242_v21  ;;  %v1214_v44 = vunpack.c.l.bf16 %v1300_v36 }
 0x13e   :  { %v1239_v57 = vunpack.c.h.bf16 %v1306_v14  ;;  %v1302_v32 = vld [vmem:[%s2045_s4 + $0xd0] sm:$0xff]  }
 0x13f   :  { %v597_v23 = vadd.f32 %v596_v47, %v534_v19  ;;  %v645_v5 = vmul.f32 0.00390625, %v643_v54  ;;  %905 = vmatpush.msrb.mxu3 %v1190_v29  ;;  %v1238_v19 = vunpack.c.l.bf16 %v1306_v14  ;;  %v1234_v47 = vunpack.c.l.bf16 %v1305_v1  ;;  %v1312_v54 = vld [vmem:[%s2045_s4 + $0x120] sm:$0xff]  }
 0x140   :  { %951 = vmatpush.msra.mxu1 %v1239_v57  ;;  %v1223_v35 = vunpack.c.h.bf16 %v1302_v32  ;;  %v1222_v17 = vunpack.c.l.bf16 %v1302_v32  ;;  %v1263_v48 = vunpack.c.h.bf16 %v1312_v54 }
 0x141   :  { %v598_v33 = vadd.f32 %v597_v23, %v535_v28  ;;  %v792_v43 = vadd.f32 %v788_v25, %v645_v5  ;;  %906 = vmatpush.msrb.mxu3 %v1187_v63  ;;  %v1231_v28 = vunpack.c.h.bf16 %v1304_v8  ;;  %v1226_v23 = vunpack.c.l.bf16 %v1303_v4  ;;  %v1341_v25 = vld [vmem:[%s2046_s5 + $0x2] ss:$0 sm:$0xff] }
 0x142   :  { %952 = vmatpush.msra.mxu1 %v1238_v19 }
 0x143   :  { %v599_v40 = vadd.f32 %v598_v33, %v536_v26  ;;  %v799_v52 = vadd.f32 %v795_v16, %v792_v43  ;;  %907 = vmatpush.msrb.mxu3 %v1186_v2  ;;  %v1247_v2 = vunpack.c.h.bf16 %v1308_v3 }
 0x144   :  { %953 = vmatpush.msra.mxu1 %v1235_v15 }
 0x145   :  { %v600_v45 = vadd.f32 %v599_v40, %v537_v7  ;;  %908 = vmatpush.msrb.mxu3 %v1183_v60  ;;  %v836_v10 = vrot.slane %v799_v52, 7  ;;  %v1215_v40 = vunpack.c.h.bf16 %v1300_v36  ;;  %v1342_v60 = vld [vmem:[%s2046_s5 + $0x3] ss:$0 sm:$0xff] }
 0x146   :  { %954 = vmatpush.msra.mxu1 %v1234_v47 }
 0x147   :  { %v601_v38 = vrot.slane %v600_v45, 4  ;;  %909 = vmatpush.msrb.mxu3 %v1182_v30 }
 0x148   :  { %955 = vmatpush.msra.mxu1 %v1231_v28 }
 0x149   :  { %v602_v18 = vadd.f32 %v601_v38, %v600_v45  ;;  %v1274_v45 = vunpack.c.l.bf16 %v1315_v9  ;;  %v1267_v38 = vunpack.c.h.bf16 %v1313_v41 }
 0x14a   :  { %956 = vmatpush.msra.mxu1 %v1230_v27 }
 0x14b   :  { %v603_v56 = vrot.slane %v602_v18, 2  ;;  %1005 = vmatpush.msra.mxu2 %v1274_v45 }
 0x14c   :  { %957 = vmatpush.msra.mxu1 %v1227_v12 }
 0x14d   :  { %v604_v62 = vadd.f32 %v603_v56, %v602_v18  ;;  %1006 = vmatpush.msra.mxu2 %v1271_v53  ;;  %v1311_v18 = vld [vmem:[%s2045_s4 + $0x118] sm:$0xff]   ;;  %v1310_v56 = vld [vmem:[%s2045_s4 + $0x110] sm:$0xff]  }
 0x14e   :  { %958 = vmatpush.msra.mxu1 %v1226_v23  ;;  %v1259_v58 = vunpack.c.h.bf16 %v1311_v18  ;;  %v1258_v5 = vunpack.c.l.bf16 %v1311_v18  ;;  %v1255_v42 = vunpack.c.h.bf16 %v1310_v56  ;;  %v1254_v29 = vunpack.c.l.bf16 %v1310_v56 }
 0x14f   :  { %v605_v0 = vrot.slane %v604_v62, 1  ;;  %1007 = vmatpush.msra.mxu2 %v1270_v51 }
 0x150   :  { %959 = vmatpush.msra.mxu1 %v1223_v35 }
 0x151   :  { %v606_v20 = vadd.f32 %v605_v0, %v604_v62  ;;  %1008 = vmatpush.msra.mxu2 %v1267_v38 }
 0x152   :  { %960 = vmatpush.msra.mxu1 %v1222_v17 }
 0x153   :  { %v644_v24 = vmul.f32 0.00390625, %v606_v20  ;;  %1009 = vmatpush.msra.mxu2 %v1266_v55  ;;  %v1246_v20 = vunpack.c.l.bf16 %v1308_v3 }
 0x154   :  { %961 = vmatpush.msra.mxu1 %v1219_v31 }
 0x155   :  { %v791_v6 = vadd.f32 %v786_v11, %v644_v24  ;;  %v1262_v11 = vunpack.c.l.bf16 %v1312_v54  ;;  %1010 = vmatpush.msra.mxu2 %v1263_v48 }
 0x156   :  { %962 = vmatpush.msra.mxu1 %v1218_v37 }
 0x157   :  { %v798_v50 = vadd.f32 %v793_v61, %v791_v6  ;;  %1011 = vmatpush.msra.mxu2 %v1262_v11  ;;  %v1309_v61 = vld [vmem:[%s2045_s4 + $0x108] sm:$0xff]   ;;  %v1343_v6 = vld [vmem:[%s2046_s5 + $0x4] ss:$0 sm:$0xff] }
 0x158   :  { %963 = vmatpush.msra.mxu1 %v1215_v40  ;;  %v1251_v62 = vunpack.c.h.bf16 %v1309_v61  ;;  %v1250_v16 = vunpack.c.l.bf16 %v1309_v61 }
 0x159   :  { %v837_v59 = vsel %vm739_vm5, %v836_v10, %v798_v50  ;;  %1012 = vmatpush.msra.mxu2 %v1259_v58 }
 0x15a   :  { %855 = vmatmul.f32.vlgmr.msrb.gmra.mxu2 %v837_v59  ;;  %964 = vmatpush.msra.mxu1 %v1214_v44 }
 0x15b   :  { %1013 = vmatpush.msra.mxu2 %v1258_v5 }
 0x15d   :  { %1014 = vmatpush.msra.mxu2 %v1255_v42 }
 0x15f   :  { %1015 = vmatpush.msra.mxu2 %v1254_v29 }
 0x161   :  { %1016 = vmatpush.msra.mxu2 %v1251_v62 }
 0x163   :  { %1017 = vmatpush.msra.mxu2 %v1250_v16 }
 0x165   :  { %1018 = vmatpush.msra.mxu2 %v1247_v2 }
 0x167   :  { %1019 = vmatpush.msra.mxu2 %v1246_v20 }
 0x1dd   :  { %v856_v26 = vpop.f32.mrf.mxu2 }
 0x1de   :  { %v857_v33 = vadd.f32 %v1340_v39, %v856_v26 }
 0x1e0   :  { %v859_v7 = vmax.f32 %v857_v33, 0.0 }
 0x1e2   :  { %910 = vmatmul.f32.vlgmr.msrb.gmra.mxu3 %v859_v7 }
 0x265   :  { %v911_v63 = vpop.f32.mrf.mxu3 }
 0x266   :  { %v912_v0 = vadd.f32 %v1341_v25, %v911_v63 }
 0x268   :  { %v914_v43 = vmax.f32 %v912_v0, 0.0 }
 0x26a   :  { %965 = vmatmul.f32.vlgmr.msra.gmra.mxu1 %v914_v43 }
 0x2e7   :  { %v966_v24 = vpop.f32.mrf.mxu1 }
 0x2e8   :  { %v967_v52 = vadd.f32 %v1342_v60, %v966_v24 }
 0x2ea   :  { %v969_v30 = vmax.f32 %v967_v52, 0.0 }
 0x2ec   :  { %1020 = vmatmul.f32.vlgmr.msra.gmra.mxu2 %v969_v30 }
 0x36f   :  { %v1021_v50 = vpop.f32.mrf.mxu2 }
 0x370   :  { %v1022_v10 = vadd.f32 %v1343_v6, %v1021_v50 }
 0x372   :  { %1024 = vst [vmem:[#allocation2] sm:$0x3] %v1022_v10 }
 0x373   :  { %1035 = dma.vmem_to_hbm [thread:$0]  %s1031_s14, 32, %s1033_s16, [#allocation3]  }
 0x374   :  { %1370 = dma.done.wait [#allocation3], 32  }
 0x375   :  { %1371 = vsyncadd [#allocation3], 4294967264 }
 0x376   :  { %1040 = vsyncpa [#allocation3], 1 }

</bundles_post_ra>
